<compile_context>
chip_gen: v7x
topology: tpu7x:2x2x1
jax: 0.10.0
libtpu: 0.0.40
codegen_flags: <defaults>
</compile_context>

<pallas_src>
import functools

import jax
import jax.numpy as jnp
from jax.experimental import pallas as pl
from jax.experimental.pallas import tpu as pltpu

_NEG_INF = -1e30
_LANES = 128

_VMEM = pl.BlockSpec(memory_space=pltpu.MemorySpace.VMEM)


def _gat(x, w, amat, bias, mask_bias, heads, out_ch):
    """One GATConv (concat=True) over the full (small) graph; returns ReLU(out).

    x         : [N, Fin]
    w         : [Fin, H*C]
    amat      : [2H, H*C]  block matrix; rows 0..H-1 hold att_src per head,
                           rows H..2H-1 hold att_dst per head
    bias      : [1, H*C]
    mask_bias : [N, N]     additive mask: 0 on edges (incl. self loops), -1e30 off
    """
    xw = jnp.dot(x, w, preferred_element_type=jnp.float32)            # [N, H*C]

    # All per-head attention logits with a single (trans-B) matmul.
    alpha_t = jnp.einsum('ak,nk->an', amat, xw,
                         preferred_element_type=jnp.float32)          # [2H, N]
    a_src = alpha_t[:heads, :]                                        # [H, N]
    a_dst = alpha_t[heads:2 * heads, :]                               # [H, N]

    # e[h, i, j] = LeakyReLU(a_dst[h,i] + a_src[h,j]); masked softmax over j,
    # batched over all heads at once.
    scores = a_dst[:, :, None] + a_src[:, None, :]                    # [H, N, N]
    scores = jnp.maximum(scores, 0.2 * scores)                        # LeakyReLU(0.2)
    scores = scores + mask_bias[None, :, :]
    scores = scores - jnp.max(scores, axis=-1, keepdims=True)
    p = jnp.exp(scores)                                               # masked -> 0
    denom = jnp.sum(p, axis=-1, keepdims=True)                        # [H, N, 1]
    attn = p * pl.reciprocal(denom, approx=True)                      # [H, N, N]

    # Neighbor aggregation per head; emit one lane-dense [N, H*C] value.
    outs = [jnp.dot(attn[h], xw[:, h * out_ch:(h + 1) * out_ch],
                    preferred_element_type=jnp.float32)
            for h in range(heads)]
    out = outs[0] if heads == 1 else jnp.concatenate(outs, axis=-1)   # [N, H*C]
    return jnp.maximum(out + bias, 0.0)                               # ReLU


def _gnn_fused_kernel(x_ref, mask_ref,
                      w1_ref, a1_ref, b1_ref,
                      w2_ref, a2_ref, b2_ref,
                      w3_ref, a3_ref, b3_ref,
                      wf_ref, bf_ref,
                      out_ref, *, heads, hidden):
    """Full network: conv1 -> relu -> conv2 -> relu -> conv3 -> relu -> fc."""
    mask_bias = mask_ref[...]

    h = _gat(x_ref[...], w1_ref[...], a1_ref[...], b1_ref[...],
             mask_bias, heads, hidden)
    # Dropout(0.3) == identity in eval mode.
    h = _gat(h, w2_ref[...], a2_ref[...], b2_ref[...],
             mask_bias, heads, hidden)
    h = _gat(h, w3_ref[...], a3_ref[...], b3_ref[...],
             mask_bias, 1, hidden)

    # Final linear (fc padded to 128 lanes) -> single dense 128-lane store.
    out_ref[...] = (jnp.dot(h, wf_ref[...],
                            preferred_element_type=jnp.float32) + bf_ref[...])


def _build_att_matrix(att_src, att_dst):
    """Build the [2H, H*C] block matrix so one matmul yields all head logits."""
    num_heads, out_ch = att_src.shape
    a = jnp.zeros((2 * num_heads, num_heads * out_ch), jnp.float32)
    for h in range(num_heads):
        a = a.at[h, h * out_ch:(h + 1) * out_ch].set(att_src[h])
        a = a.at[num_heads + h, h * out_ch:(h + 1) * out_ch].set(att_dst[h])
    return a


def gnn_forward(x, adj, params):
    n = x.shape[0]
    hidden = params["hidden"]
    heads = params["heads"]
    num_classes = params["num_classes"]

    # Additive adjacency mask (0 on edges incl. self loops, -1e30 elsewhere).
    mask_bias = jnp.where(adj > 0, 0.0, _NEG_INF).astype(jnp.float32)

    w1, s1, d1, b1 = params["conv1"]
    w2, s2, d2, b2 = params["conv2"]
    w3, s3, d3, b3 = params["conv3"]
    wf, bf = params["fc"]

    a1 = _build_att_matrix(s1, d1)
    a2 = _build_att_matrix(s2, d2)
    a3 = _build_att_matrix(s3, d3)

    # Zero-pad fc to 128 output lanes; slice back to num_classes afterwards.
    wf_pad = jnp.zeros((wf.shape[0], _LANES), jnp.float32)
    wf_pad = wf_pad.at[:, :num_classes].set(wf)
    bf_pad = jnp.zeros((1, _LANES), jnp.float32)
    bf_pad = bf_pad.at[:, :num_classes].set(bf)

    kernel = functools.partial(_gnn_fused_kernel, heads=heads, hidden=hidden)
    out = pl.pallas_call(
        kernel,
        out_shape=jax.ShapeDtypeStruct((n, _LANES), jnp.float32),
        in_specs=[_VMEM] * 13,
        out_specs=_VMEM,
    )(x, mask_bias, w1, a1, b1, w2, a2, b2, w3, a3, b3, wf_pad, bf_pad)
    return out[:, :num_classes]


def _glorot(key, shape):
    fan_in, fan_out = shape[0], shape[-1]
    lim = jnp.sqrt(6.0 / (fan_in + fan_out))
    return jax.random.uniform(key, shape, jnp.float32, -lim, lim)


if __name__ == "__main__":
    key = jax.random.PRNGKey(0)
    keys = jax.random.split(key, 16)

    # Small shapes consistent with the module.
    N = 16            # number of graph nodes
    input_dim = 8
    hidden = 32
    num_classes = 4
    heads = 4

    # Node features.
    x = jax.random.normal(keys[0], (N, input_dim), dtype=jnp.float32)

    # Deterministic ring graph, both directions: edge_index [2, E].
    idx = jnp.arange(N)
    src = jnp.concatenate([idx, (idx + 1) % N])
    dst = jnp.concatenate([(idx + 1) % N, idx])
    edge_index = jnp.stack([src, dst])                    # [2, 2N]

    # Dense adjacency mask with self loops: adj[i, j] = 1 iff edge j -> i.
    adj = jnp.zeros((N, N), jnp.float32)
    adj = adj.at[edge_index[1], edge_index[0]].set(1.0)
    adj = adj.at[idx, idx].set(1.0)

    # Deterministic synthetic parameters (shapes follow GATConv / Linear).
    params = {
        "hidden": hidden,
        "heads": heads,
        "num_classes": num_classes,
        # conv1: GATConv(input_dim, hidden, heads=4, concat=True)
        "conv1": (
            _glorot(keys[1], (input_dim, heads * hidden)),   # W
            _glorot(keys[2], (heads, hidden)),               # att_src [H, C]
            _glorot(keys[3], (heads, hidden)),               # att_dst [H, C]
            jnp.zeros((1, heads * hidden), jnp.float32),     # bias
        ),
        # conv2: GATConv(hidden*4, hidden, heads=4, concat=True)
        "conv2": (
            _glorot(keys[4], (heads * hidden, heads * hidden)),
            _glorot(keys[5], (heads, hidden)),
            _glorot(keys[6], (heads, hidden)),
            jnp.zeros((1, heads * hidden), jnp.float32),
        ),
        # conv3: GATConv(hidden*4, hidden, heads=1, concat=True)
        "conv3": (
            _glorot(keys[7], (heads * hidden, hidden)),
            _glorot(keys[8], (1, hidden)),
            _glorot(keys[9], (1, hidden)),
            jnp.zeros((1, hidden), jnp.float32),
        ),
        # fc: Linear(hidden, num_classes)
        "fc": (
            _glorot(keys[10], (hidden, num_classes)),
            jnp.zeros((1, num_classes), jnp.float32),
        ),
    }

    fwd = jax.jit(lambda x_, adj_: gnn_forward(x_, adj_, params))
    out = fwd(x, adj)
    jax.block_until_ready(out)
    assert out.shape == (N, num_classes)
    print("KERNEL_OK")
</pallas_src>

<mosaic_0001>
module attributes {stable_mosaic.version = 11 : i64} {
  func.func @_gnn_fused_kernel(%arg0: memref<16x8xf32, #tpu.memory_space<vmem>>, %arg1: memref<16x16xf32, #tpu.memory_space<vmem>>, %arg2: memref<8x128xf32, #tpu.memory_space<vmem>>, %arg3: memref<8x128xf32, #tpu.memory_space<vmem>>, %arg4: memref<1x128xf32, #tpu.memory_space<vmem>>, %arg5: memref<128x128xf32, #tpu.memory_space<vmem>>, %arg6: memref<8x128xf32, #tpu.memory_space<vmem>>, %arg7: memref<1x128xf32, #tpu.memory_space<vmem>>, %arg8: memref<128x32xf32, #tpu.memory_space<vmem>>, %arg9: memref<2x32xf32, #tpu.memory_space<vmem>>, %arg10: memref<1x32xf32, #tpu.memory_space<vmem>>, %arg11: memref<32x128xf32, #tpu.memory_space<vmem>>, %arg12: memref<1x128xf32, #tpu.memory_space<vmem>>, %arg13: memref<16x128xf32, #tpu.memory_space<vmem>>) attributes {dimension_semantics = [], scalar_prefetch = 0 : i64, scratch_operands = 0 : i64, tpu.core_type = #tpu.core_type<tc>} {
    %c0 = arith.constant 0 : index
    %c0_0 = arith.constant 0 : index
    %0 = vector.load %arg1[%c0, %c0_0] : memref<16x16xf32, #tpu.memory_space<vmem>>, vector<16x16xf32>
    %c0_1 = arith.constant 0 : index
    %c0_2 = arith.constant 0 : index
    %1 = vector.load %arg0[%c0_1, %c0_2] : memref<16x8xf32, #tpu.memory_space<vmem>>, vector<16x8xf32>
    %c0_3 = arith.constant 0 : index
    %c0_4 = arith.constant 0 : index
    %2 = vector.load %arg2[%c0_3, %c0_4] : memref<8x128xf32, #tpu.memory_space<vmem>>, vector<8x128xf32>
    %c0_5 = arith.constant 0 : index
    %c0_6 = arith.constant 0 : index
    %3 = vector.load %arg3[%c0_5, %c0_6] : memref<8x128xf32, #tpu.memory_space<vmem>>, vector<8x128xf32>
    %c0_7 = arith.constant 0 : index
    %c0_8 = arith.constant 0 : index
    %4 = vector.load %arg4[%c0_7, %c0_8] : memref<1x128xf32, #tpu.memory_space<vmem>>, vector<1x128xf32>
    %cst = arith.constant dense<0.000000e+00> : vector<16x128xf32>
    %5 = tpu.matmul %1, %2, %cst {dimension_numbers = #tpu.dot_dimension_numbers<[1], [0], [0], [1], [0, 0, 1, 1], [], []>} : vector<16x8xf32>, vector<8x128xf32>, vector<16x128xf32> -> vector<16x128xf32>
    "tpu.trace_start"() <{level = 10 : i32, message = "ak,nk->an"}> : () -> ()
    %cst_9 = arith.constant dense<0.000000e+00> : vector<8x16xf32>
    %6 = tpu.matmul %3, %5, %cst_9 {dimension_numbers = #tpu.dot_dimension_numbers<[1], [1], [0], [0], [0, 0, 1, 0], [], []>} : vector<8x128xf32>, vector<16x128xf32>, vector<8x16xf32> -> vector<8x16xf32>
    "tpu.trace_stop"() : () -> ()
    %7 = vector.extract_strided_slice %6 {offsets = [0, 0], sizes = [4, 16], strides = [1, 1]} : vector<8x16xf32> to vector<4x16xf32>
    %8 = vector.extract_strided_slice %6 {offsets = [4, 0], sizes = [4, 16], strides = [1, 1]} : vector<8x16xf32> to vector<4x16xf32>
    %9 = vector.shape_cast %8 : vector<4x16xf32> to vector<4x16x1xf32>
    %10 = vector.shape_cast %7 : vector<4x16xf32> to vector<4x1x16xf32>
    %11 = vector.broadcast %9 : vector<4x16x1xf32> to vector<4x16x16xf32>
    %12 = vector.broadcast %10 : vector<4x1x16xf32> to vector<4x16x16xf32>
    %13 = arith.addf %11, %12 : vector<4x16x16xf32>
    %cst_10 = arith.constant 2.000000e-01 : f32
    %14 = vector.broadcast %cst_10 : f32 to vector<4x16x16xf32>
    %15 = arith.mulf %14, %13 : vector<4x16x16xf32>
    %16 = arith.maximumf %13, %15 : vector<4x16x16xf32>
    %17 = vector.shape_cast %0 : vector<16x16xf32> to vector<1x16x16xf32>
    %18 = vector.broadcast %17 : vector<1x16x16xf32> to vector<4x16x16xf32>
    %19 = arith.addf %16, %18 : vector<4x16x16xf32>
    %cst_11 = arith.constant dense<0xFF800000> : vector<4x16xf32>
    %20 = vector.multi_reduction <maximumf>, %19, %cst_11 [2] : vector<4x16x16xf32> to vector<4x16xf32>
    %21 = vector.shape_cast %20 : vector<4x16xf32> to vector<4x16x1xf32>
    %22 = vector.broadcast %21 : vector<4x16x1xf32> to vector<4x16x16xf32>
    %23 = arith.subf %19, %22 : vector<4x16x16xf32>
    %24 = math.exp %23 : vector<4x16x16xf32>
    %cst_12 = arith.constant dense<0.000000e+00> : vector<4x16xf32>
    %25 = vector.multi_reduction <add>, %24, %cst_12 [2] : vector<4x16x16xf32> to vector<4x16xf32>
    %26 = vector.shape_cast %25 : vector<4x16xf32> to vector<4x16x1xf32>
    %27 = tpu.reciprocal %26 {approx = true} : vector<4x16x1xf32> -> vector<4x16x1xf32>
    %28 = vector.broadcast %27 : vector<4x16x1xf32> to vector<4x16x16xf32>
    %29 = arith.mulf %24, %28 : vector<4x16x16xf32>
    %30 = vector.extract_strided_slice %29 {offsets = [0, 0, 0], sizes = [1, 16, 16], strides = [1, 1, 1]} : vector<4x16x16xf32> to vector<1x16x16xf32>
    %31 = vector.shape_cast %30 : vector<1x16x16xf32> to vector<16x16xf32>
    %32 = vector.extract_strided_slice %5 {offsets = [0, 0], sizes = [16, 32], strides = [1, 1]} : vector<16x128xf32> to vector<16x32xf32>
    %cst_13 = arith.constant dense<0.000000e+00> : vector<16x32xf32>
    %33 = tpu.matmul %31, %32, %cst_13 {dimension_numbers = #tpu.dot_dimension_numbers<[1], [0], [0], [1], [0, 0, 1, 1], [], []>} : vector<16x16xf32>, vector<16x32xf32>, vector<16x32xf32> -> vector<16x32xf32>
    %34 = vector.extract_strided_slice %29 {offsets = [1, 0, 0], sizes = [1, 16, 16], strides = [1, 1, 1]} : vector<4x16x16xf32> to vector<1x16x16xf32>
    %35 = vector.shape_cast %34 : vector<1x16x16xf32> to vector<16x16xf32>
    %36 = vector.extract_strided_slice %5 {offsets = [0, 32], sizes = [16, 32], strides = [1, 1]} : vector<16x128xf32> to vector<16x32xf32>
    %cst_14 = arith.constant dense<0.000000e+00> : vector<16x32xf32>
    %37 = tpu.matmul %35, %36, %cst_14 {dimension_numbers = #tpu.dot_dimension_numbers<[1], [0], [0], [1], [0, 0, 1, 1], [], []>} : vector<16x16xf32>, vector<16x32xf32>, vector<16x32xf32> -> vector<16x32xf32>
    %38 = vector.extract_strided_slice %29 {offsets = [2, 0, 0], sizes = [1, 16, 16], strides = [1, 1, 1]} : vector<4x16x16xf32> to vector<1x16x16xf32>
    %39 = vector.shape_cast %38 : vector<1x16x16xf32> to vector<16x16xf32>
    %40 = vector.extract_strided_slice %5 {offsets = [0, 64], sizes = [16, 32], strides = [1, 1]} : vector<16x128xf32> to vector<16x32xf32>
    %cst_15 = arith.constant dense<0.000000e+00> : vector<16x32xf32>
    %41 = tpu.matmul %39, %40, %cst_15 {dimension_numbers = #tpu.dot_dimension_numbers<[1], [0], [0], [1], [0, 0, 1, 1], [], []>} : vector<16x16xf32>, vector<16x32xf32>, vector<16x32xf32> -> vector<16x32xf32>
    %42 = vector.extract_strided_slice %29 {offsets = [3, 0, 0], sizes = [1, 16, 16], strides = [1, 1, 1]} : vector<4x16x16xf32> to vector<1x16x16xf32>
    %43 = vector.shape_cast %42 : vector<1x16x16xf32> to vector<16x16xf32>
    %44 = vector.extract_strided_slice %5 {offsets = [0, 96], sizes = [16, 32], strides = [1, 1]} : vector<16x128xf32> to vector<16x32xf32>
    %cst_16 = arith.constant dense<0.000000e+00> : vector<16x32xf32>
    %45 = tpu.matmul %43, %44, %cst_16 {dimension_numbers = #tpu.dot_dimension_numbers<[1], [0], [0], [1], [0, 0, 1, 1], [], []>} : vector<16x16xf32>, vector<16x32xf32>, vector<16x32xf32> -> vector<16x32xf32>
    %46 = tpu.concatenate %33, %37, %41, %45 in 1 : vector<16x32xf32>, vector<16x32xf32>, vector<16x32xf32>, vector<16x32xf32> -> vector<16x128xf32>
    %47 = vector.broadcast %4 : vector<1x128xf32> to vector<16x128xf32>
    %48 = arith.addf %46, %47 : vector<16x128xf32>
    %cst_17 = arith.constant 0.000000e+00 : f32
    %49 = vector.broadcast %cst_17 : f32 to vector<16x128xf32>
    %50 = arith.maximumf %48, %49 : vector<16x128xf32>
    %c0_18 = arith.constant 0 : index
    %c0_19 = arith.constant 0 : index
    %51 = vector.load %arg5[%c0_18, %c0_19] : memref<128x128xf32, #tpu.memory_space<vmem>>, vector<128x128xf32>
    %c0_20 = arith.constant 0 : index
    %c0_21 = arith.constant 0 : index
    %52 = vector.load %arg6[%c0_20, %c0_21] : memref<8x128xf32, #tpu.memory_space<vmem>>, vector<8x128xf32>
    %c0_22 = arith.constant 0 : index
    %c0_23 = arith.constant 0 : index
    %53 = vector.load %arg7[%c0_22, %c0_23] : memref<1x128xf32, #tpu.memory_space<vmem>>, vector<1x128xf32>
    %cst_24 = arith.constant dense<0.000000e+00> : vector<16x128xf32>
    %54 = tpu.matmul %50, %51, %cst_24 {dimension_numbers = #tpu.dot_dimension_numbers<[1], [0], [0], [1], [0, 0, 1, 1], [], []>} : vector<16x128xf32>, vector<128x128xf32>, vector<16x128xf32> -> vector<16x128xf32>
    "tpu.trace_start"() <{level = 10 : i32, message = "ak,nk->an"}> : () -> ()
    %cst_25 = arith.constant dense<0.000000e+00> : vector<8x16xf32>
    %55 = tpu.matmul %52, %54, %cst_25 {dimension_numbers = #tpu.dot_dimension_numbers<[1], [1], [0], [0], [0, 0, 1, 0], [], []>} : vector<8x128xf32>, vector<16x128xf32>, vector<8x16xf32> -> vector<8x16xf32>
    "tpu.trace_stop"() : () -> ()
    %56 = vector.extract_strided_slice %55 {offsets = [0, 0], sizes = [4, 16], strides = [1, 1]} : vector<8x16xf32> to vector<4x16xf32>
    %57 = vector.extract_strided_slice %55 {offsets = [4, 0], sizes = [4, 16], strides = [1, 1]} : vector<8x16xf32> to vector<4x16xf32>
    %58 = vector.shape_cast %57 : vector<4x16xf32> to vector<4x16x1xf32>
    %59 = vector.shape_cast %56 : vector<4x16xf32> to vector<4x1x16xf32>
    %60 = vector.broadcast %58 : vector<4x16x1xf32> to vector<4x16x16xf32>
    %61 = vector.broadcast %59 : vector<4x1x16xf32> to vector<4x16x16xf32>
    %62 = arith.addf %60, %61 : vector<4x16x16xf32>
    %cst_26 = arith.constant 2.000000e-01 : f32
    %63 = vector.broadcast %cst_26 : f32 to vector<4x16x16xf32>
    %64 = arith.mulf %63, %62 : vector<4x16x16xf32>
    %65 = arith.maximumf %62, %64 : vector<4x16x16xf32>
    %66 = vector.shape_cast %0 : vector<16x16xf32> to vector<1x16x16xf32>
    %67 = vector.broadcast %66 : vector<1x16x16xf32> to vector<4x16x16xf32>
    %68 = arith.addf %65, %67 : vector<4x16x16xf32>
    %cst_27 = arith.constant dense<0xFF800000> : vector<4x16xf32>
    %69 = vector.multi_reduction <maximumf>, %68, %cst_27 [2] : vector<4x16x16xf32> to vector<4x16xf32>
    %70 = vector.shape_cast %69 : vector<4x16xf32> to vector<4x16x1xf32>
    %71 = vector.broadcast %70 : vector<4x16x1xf32> to vector<4x16x16xf32>
    %72 = arith.subf %68, %71 : vector<4x16x16xf32>
    %73 = math.exp %72 : vector<4x16x16xf32>
    %cst_28 = arith.constant dense<0.000000e+00> : vector<4x16xf32>
    %74 = vector.multi_reduction <add>, %73, %cst_28 [2] : vector<4x16x16xf32> to vector<4x16xf32>
    %75 = vector.shape_cast %74 : vector<4x16xf32> to vector<4x16x1xf32>
    %76 = tpu.reciprocal %75 {approx = true} : vector<4x16x1xf32> -> vector<4x16x1xf32>
    %77 = vector.broadcast %76 : vector<4x16x1xf32> to vector<4x16x16xf32>
    %78 = arith.mulf %73, %77 : vector<4x16x16xf32>
    %79 = vector.extract_strided_slice %78 {offsets = [0, 0, 0], sizes = [1, 16, 16], strides = [1, 1, 1]} : vector<4x16x16xf32> to vector<1x16x16xf32>
    %80 = vector.shape_cast %79 : vector<1x16x16xf32> to vector<16x16xf32>
    %81 = vector.extract_strided_slice %54 {offsets = [0, 0], sizes = [16, 32], strides = [1, 1]} : vector<16x128xf32> to vector<16x32xf32>
    %cst_29 = arith.constant dense<0.000000e+00> : vector<16x32xf32>
    %82 = tpu.matmul %80, %81, %cst_29 {dimension_numbers = #tpu.dot_dimension_numbers<[1], [0], [0], [1], [0, 0, 1, 1], [], []>} : vector<16x16xf32>, vector<16x32xf32>, vector<16x32xf32> -> vector<16x32xf32>
    %83 = vector.extract_strided_slice %78 {offsets = [1, 0, 0], sizes = [1, 16, 16], strides = [1, 1, 1]} : vector<4x16x16xf32> to vector<1x16x16xf32>
    %84 = vector.shape_cast %83 : vector<1x16x16xf32> to vector<16x16xf32>
    %85 = vector.extract_strided_slice %54 {offsets = [0, 32], sizes = [16, 32], strides = [1, 1]} : vector<16x128xf32> to vector<16x32xf32>
    %cst_30 = arith.constant dense<0.000000e+00> : vector<16x32xf32>
    %86 = tpu.matmul %84, %85, %cst_30 {dimension_numbers = #tpu.dot_dimension_numbers<[1], [0], [0], [1], [0, 0, 1, 1], [], []>} : vector<16x16xf32>, vector<16x32xf32>, vector<16x32xf32> -> vector<16x32xf32>
    %87 = vector.extract_strided_slice %78 {offsets = [2, 0, 0], sizes = [1, 16, 16], strides = [1, 1, 1]} : vector<4x16x16xf32> to vector<1x16x16xf32>
    %88 = vector.shape_cast %87 : vector<1x16x16xf32> to vector<16x16xf32>
    %89 = vector.extract_strided_slice %54 {offsets = [0, 64], sizes = [16, 32], strides = [1, 1]} : vector<16x128xf32> to vector<16x32xf32>
    %cst_31 = arith.constant dense<0.000000e+00> : vector<16x32xf32>
    %90 = tpu.matmul %88, %89, %cst_31 {dimension_numbers = #tpu.dot_dimension_numbers<[1], [0], [0], [1], [0, 0, 1, 1], [], []>} : vector<16x16xf32>, vector<16x32xf32>, vector<16x32xf32> -> vector<16x32xf32>
    %91 = vector.extract_strided_slice %78 {offsets = [3, 0, 0], sizes = [1, 16, 16], strides = [1, 1, 1]} : vector<4x16x16xf32> to vector<1x16x16xf32>
    %92 = vector.shape_cast %91 : vector<1x16x16xf32> to vector<16x16xf32>
    %93 = vector.extract_strided_slice %54 {offsets = [0, 96], sizes = [16, 32], strides = [1, 1]} : vector<16x128xf32> to vector<16x32xf32>
    %cst_32 = arith.constant dense<0.000000e+00> : vector<16x32xf32>
    %94 = tpu.matmul %92, %93, %cst_32 {dimension_numbers = #tpu.dot_dimension_numbers<[1], [0], [0], [1], [0, 0, 1, 1], [], []>} : vector<16x16xf32>, vector<16x32xf32>, vector<16x32xf32> -> vector<16x32xf32>
    %95 = tpu.concatenate %82, %86, %90, %94 in 1 : vector<16x32xf32>, vector<16x32xf32>, vector<16x32xf32>, vector<16x32xf32> -> vector<16x128xf32>
    %96 = vector.broadcast %53 : vector<1x128xf32> to vector<16x128xf32>
    %97 = arith.addf %95, %96 : vector<16x128xf32>
    %cst_33 = arith.constant 0.000000e+00 : f32
    %98 = vector.broadcast %cst_33 : f32 to vector<16x128xf32>
    %99 = arith.maximumf %97, %98 : vector<16x128xf32>
    %c0_34 = arith.constant 0 : index
    %c0_35 = arith.constant 0 : index
    %100 = vector.load %arg8[%c0_34, %c0_35] : memref<128x32xf32, #tpu.memory_space<vmem>>, vector<128x32xf32>
    %c0_36 = arith.constant 0 : index
    %c0_37 = arith.constant 0 : index
    %101 = vector.load %arg9[%c0_36, %c0_37] : memref<2x32xf32, #tpu.memory_space<vmem>>, vector<2x32xf32>
    %c0_38 = arith.constant 0 : index
    %c0_39 = arith.constant 0 : index
    %102 = vector.load %arg10[%c0_38, %c0_39] : memref<1x32xf32, #tpu.memory_space<vmem>>, vector<1x32xf32>
    %cst_40 = arith.constant dense<0.000000e+00> : vector<16x32xf32>
    %103 = tpu.matmul %99, %100, %cst_40 {dimension_numbers = #tpu.dot_dimension_numbers<[1], [0], [0], [1], [0, 0, 1, 1], [], []>} : vector<16x128xf32>, vector<128x32xf32>, vector<16x32xf32> -> vector<16x32xf32>
    "tpu.trace_start"() <{level = 10 : i32, message = "ak,nk->an"}> : () -> ()
    %cst_41 = arith.constant dense<0.000000e+00> : vector<2x16xf32>
    %104 = tpu.matmul %101, %103, %cst_41 {dimension_numbers = #tpu.dot_dimension_numbers<[1], [1], [0], [0], [0, 0, 1, 0], [], []>} : vector<2x32xf32>, vector<16x32xf32>, vector<2x16xf32> -> vector<2x16xf32>
    "tpu.trace_stop"() : () -> ()
    %105 = vector.extract_strided_slice %104 {offsets = [0, 0], sizes = [1, 16], strides = [1, 1]} : vector<2x16xf32> to vector<1x16xf32>
    %106 = vector.extract_strided_slice %104 {offsets = [1, 0], sizes = [1, 16], strides = [1, 1]} : vector<2x16xf32> to vector<1x16xf32>
    %107 = vector.shape_cast %106 : vector<1x16xf32> to vector<1x16x1xf32>
    %108 = vector.shape_cast %105 : vector<1x16xf32> to vector<1x1x16xf32>
    %109 = vector.broadcast %107 : vector<1x16x1xf32> to vector<1x16x16xf32>
    %110 = vector.broadcast %108 : vector<1x1x16xf32> to vector<1x16x16xf32>
    %111 = arith.addf %109, %110 : vector<1x16x16xf32>
    %cst_42 = arith.constant 2.000000e-01 : f32
    %112 = vector.broadcast %cst_42 : f32 to vector<1x16x16xf32>
    %113 = arith.mulf %112, %111 : vector<1x16x16xf32>
    %114 = arith.maximumf %111, %113 : vector<1x16x16xf32>
    %115 = vector.shape_cast %0 : vector<16x16xf32> to vector<1x16x16xf32>
    %116 = arith.addf %114, %115 : vector<1x16x16xf32>
    %cst_43 = arith.constant dense<0xFF800000> : vector<1x16xf32>
    %117 = vector.multi_reduction <maximumf>, %116, %cst_43 [2] : vector<1x16x16xf32> to vector<1x16xf32>
    %118 = vector.shape_cast %117 : vector<1x16xf32> to vector<1x16x1xf32>
    %119 = vector.broadcast %118 : vector<1x16x1xf32> to vector<1x16x16xf32>
    %120 = arith.subf %116, %119 : vector<1x16x16xf32>
    %121 = math.exp %120 : vector<1x16x16xf32>
    %cst_44 = arith.constant dense<0.000000e+00> : vector<1x16xf32>
    %122 = vector.multi_reduction <add>, %121, %cst_44 [2] : vector<1x16x16xf32> to vector<1x16xf32>
    %123 = vector.shape_cast %122 : vector<1x16xf32> to vector<1x16x1xf32>
    %124 = tpu.reciprocal %123 {approx = true} : vector<1x16x1xf32> -> vector<1x16x1xf32>
    %125 = vector.broadcast %124 : vector<1x16x1xf32> to vector<1x16x16xf32>
    %126 = arith.mulf %121, %125 : vector<1x16x16xf32>
    %127 = vector.shape_cast %126 : vector<1x16x16xf32> to vector<16x16xf32>
    %cst_45 = arith.constant dense<0.000000e+00> : vector<16x32xf32>
    %128 = tpu.matmul %127, %103, %cst_45 {dimension_numbers = #tpu.dot_dimension_numbers<[1], [0], [0], [1], [0, 0, 1, 1], [], []>} : vector<16x16xf32>, vector<16x32xf32>, vector<16x32xf32> -> vector<16x32xf32>
    %129 = vector.broadcast %102 : vector<1x32xf32> to vector<16x32xf32>
    %130 = arith.addf %128, %129 : vector<16x32xf32>
    %cst_46 = arith.constant 0.000000e+00 : f32
    %131 = vector.broadcast %cst_46 : f32 to vector<16x32xf32>
    %132 = arith.maximumf %130, %131 : vector<16x32xf32>
    %c0_47 = arith.constant 0 : index
    %c0_48 = arith.constant 0 : index
    %133 = vector.load %arg11[%c0_47, %c0_48] : memref<32x128xf32, #tpu.memory_space<vmem>>, vector<32x128xf32>
    %cst_49 = arith.constant dense<0.000000e+00> : vector<16x128xf32>
    %134 = tpu.matmul %132, %133, %cst_49 {dimension_numbers = #tpu.dot_dimension_numbers<[1], [0], [0], [1], [0, 0, 1, 1], [], []>} : vector<16x32xf32>, vector<32x128xf32>, vector<16x128xf32> -> vector<16x128xf32>
    %c0_50 = arith.constant 0 : index
    %c0_51 = arith.constant 0 : index
    %135 = vector.load %arg12[%c0_50, %c0_51] : memref<1x128xf32, #tpu.memory_space<vmem>>, vector<1x128xf32>
    %136 = vector.broadcast %135 : vector<1x128xf32> to vector<16x128xf32>
    %137 = arith.addf %134, %136 : vector<16x128xf32>
    %c0_52 = arith.constant 0 : index
    %c0_53 = arith.constant 0 : index
    %138 = vector.load %arg13[%c0_52, %c0_53] : memref<16x128xf32, #tpu.memory_space<vmem>>, vector<16x128xf32>
    tpu.vector_store %arg13[%c0_52, %c0_53], %137 {strides = array<i32>} : memref<16x128xf32, #tpu.memory_space<vmem>>, vector<16x128xf32>,
    return
  }
}

</mosaic_0001>

<bundles_post_ra>
// kernel: _lambda_.1
= control target key start
LH: loop header
LB: loop body
LE: loop exit
PB: predicated region body
PF: predicated region fallthrough
CT: control target
= control target key end

     0   :  { %18 = vsyncpa [#allocation3], 0  ;;  %s2520_s25 = smov [#allocation2]   ;;  %s2892_s0 = inlined_call_operand.vmem [shape: f32[16,8], index: 0, kind: input, shape index: {}]   ;;  %s2893_s1 = inlined_call_operand.vmem [shape: f32[16,16], index: 1, kind: input, shape index: {}]   ;;  %s2894_s2 = inlined_call_operand.vmem [shape: f32[8,128], index: 2, kind: input, shape index: {}]   ;;  %s2895_s3 = inlined_call_operand.vmem [shape: f32[8,128], index: 3, kind: input, shape index: {}]   ;;  %s2896_s4 = inlined_call_operand.vmem [shape: f32[1,128], index: 4, kind: input, shape index: {}, may-alias: {4,7,12}]   ;;  %s2897_s5 = inlined_call_operand.vmem [shape: f32[128,128], index: 5, kind: input, shape index: {}]   ;;  %s2898_s6 = inlined_call_operand.vmem [shape: f32[8,128], index: 6, kind: input, shape index: {}]   ;;  %s2899_s7 = inlined_call_operand.vmem [shape: f32[1,128], index: 7, kind: input, shape index: {}, may-alias: {4,7,12}]   ;;  %s2900_s8 = inlined_call_operand.hbm [shape: f32[128,32], index: 8, kind: input, shape index: {}]   ;;  %s2901_s9 = inlined_call_operand.vmem [shape: f32[2,32], index: 9, kind: input, shape index: {}]   ;;  %s2902_s10 = inlined_call_operand.vmem [shape: f32[1,32], index: 10, kind: input, shape index: {}]   ;;  %s2903_s11 = inlined_call_operand.vmem [shape: f32[32,128], index: 11, kind: input, shape index: {}]   ;;  %s2904_s12 = inlined_call_operand.vmem [shape: f32[1,128], index: 12, kind: input, shape index: {}, may-alias: {4,7,12}]   ;;  %s2905_s13 = inlined_call_operand.vmem [shape: f32[16,128], index: 13, kind: output, shape index: {}]  }
   0x1   :  { %s40_s26 = sshll.u32 %s2520_s25, 4  ;;  %s2496_s29 = scalar_lea.hbm %s2900_s8, 2048  ;;  %s41_s26 = int_to_ptr.vmem [resolvable:$true] %s40_s26 }
   0x2   :  { %p2497_p0 = scmp.ne.s32.totalorder %s2900_s8, %s2496_s29  ;;  %p2500_p1 = scmp.lt.u32.totalorder %s2496_s29, %s2900_s8 }
   0x4   :  { %p2502_p2 = pnand %p2500_p1, %p2497_p0 }
   0x6   :  { %2505 = shalt.err (!%p2502_p2)
}
   0x7   :  { %s2506_s17 = scalar_lea.vmem %s41_s26, 2048  ;;  %p2511_p4 = scmp.lt.s32.totalorder %s41_s26, %s41_s26 }
   0x8   :  { %p2507_p3 = scmp.ne.s32.totalorder %s41_s26, %s2506_s17  ;;  %p2512_p5 = scmp.lt.s32.totalorder %s2506_s17, %s2506_s17 }
   0xa   :  { %p2513_p6 = por %p2512_p5, %p2511_p4 }
   0xc   :  { %p2514_p7 = pnand %p2513_p6, %p2507_p3 }
   0xe   :  { %2517 = shalt.err (!%p2514_p7)
}
   0xf   :  { %s2521_s18 = smov 128   ;;  %s2522_s19 = smov 8  }
  0x10   :  { %46 = dma.hbm_to_vmem [thread:$0]  %s2900_s8, 2048, %s41_s26, [#allocation3], %s2521_s18, %s2521_s18, %s2522_s19  }
  0x11   :  { %2518 = dma.done.wait [#allocation3], 2048  }
  0x12   :  { %2519 = vsyncadd [#allocation3], 4294965248  ;;  %vm65_vm0 = vcmask 64512   ;;  %v62_v0 = vld [vmem:[%s2894_s2] sm:$0xff]  ;;  %v61_v2 = vld [vmem:[%s2892_s0 + $0x8] sm:$0xff]  ;;  %v2523_v3 = vmov 0.0|0.0   ;;  %v217_v10 = vlaneseq }
  0x13   :  { %v60_v1 = vld [vmem:[%s2892_s0] sm:$0xff]  ;;  %2094 = vmatprep.subr.mxu1 %v62_v0  ;;  %vm2524_vm1 = vmmov 0   ;;  %v2525_v4 = vmov 0.0   ;;  %v2526_v22 = vmov 1966171168   ;;  %vm338_vm2 = vcmask 130048  }
  0x14   :  { %2096 = vmatprep.mubr.msk.f32.mxu1 %vm65_vm0, %v60_v1  ;;  %2095 = vmatpush3.msra.mxu1 %v62_v0  ;;  %v63_v9 = vld [vmem:[%s2895_s3] sm:$0xff]  ;;  %v2629_v11 = vshrl.u32 %v217_v10, 7  ;;  %v263_v23 = vunpack.c.l.s4 %v2526_v22  ;;  %v2664_v54 = vld [vmem:[%s2893_s1 + $0x8] sm:$0xff]  ;;  %s2527_s30 = smov 96   ;;  %s2528_s14 = smov 32   ;;  %vm795_vm3 = vcmask 261120  }
  0x15   :  { %2097 = vmatmul.mubr.msk.f32.vlgmr.msra.gmra.mrb[0].mxu1 %vm65_vm0, %v61_v2  ;;  %2264 = vmatprep.subr.bf16.mxu1 %v2523_v3  ;;  %v2657_v42 = vld [vmem:[%s2893_s1] sm:$0xff]  ;;  %s2529_s15 = smov 64   ;;  %vm798_vm4 = vcmask 523264   ;;  %vm801_vm5 = vcmask 785408   ;;  %vm2368_vm6 = vmpackc.low %vm795_vm3, %vm795_vm3 }
  0x16   :  { %2103 = vmatprep.mubr.msk.f32.mxu1 %vm2524_vm1, %v2525_v4  ;;  %v230_v12 = vsub.s32 5, %v2629_v11  ;;  %v219_v13 = vsub.s32 4, %v2629_v11  ;;  %v241_v18 = vsub.s32 6, %v2629_v11  ;;  %v252_v20 = vsub.s32 7, %v2629_v11 }
  0x17   :  { %v264_v24 = vunpack.c.0.s8 %v263_v23  ;;  %v2649_v29 = vsub.s32 0, %v2629_v11 }
  0x19   :  { %v2644_v25 = vsub.s32 %v264_v24, %v2629_v11 }
  0xe8   :  { %v2098_v5 = vpop.f32.mrb[0].mxu1 }
  0xe9   :  { %v138_v6 = vpop.f32.mrb[1].mxu1 }
  0xea   :  { %v2265_v7 = vpack.c.bf16 %v2098_v5, %v138_v6  ;;  %v2624_v8 = vpack.i.bf16 %v2098_v5, %v138_v6 }
  0xec   :  { %2266 = vmatpush3.bf16.xpose.msra.mxu1 %v2265_v7  ;;  %2268 = vmatprep.subr.bf16.mxu0 %v2265_v7 }
  0xed   :  { %2270 = vmatpush3.bf16.msra.mxu0 %v2265_v7 }
  0xf3   :  { %2104 = vmatmul.mubr.f32.vlgmr.msra.gmra.mrb[2].mxu1 %v63_v9 }
 0x1c6   :  { %v213_v14 = vpop.f32.mrb[2].mxu1 }
 0x1c7   :  { %v2105_v15 = vpop.f32.mrb[3].mxu1  ;;  %v231_v16 = vrot.slane %v213_v14, %v230_v12  ;;  %v220_v17 = vrot.slane %v213_v14, %v219_v13  ;;  %v242_v19 = vrot.slane %v213_v14, %v241_v18  ;;  %v253_v21 = vrot.slane %v213_v14, %v252_v20 }
 0x1c8   :  { %v268_v26 = vrot.slane %v213_v14, %v2644_v25 }
 0x1c9   :  { %233 = vbcast.lane.b32.xlu1 %v231_v16, 256  ;;  %222 = vbcast.lane.b32.xlu0 %v220_v17, 256 }
 0x1ca   :  { %v269_v27 = vcombine.high %v268_v26, %v268_v26  ;;  %v276_v30 = vrot.slane %v268_v26, %v2644_v25 }
 0x1cc   :  { %v283_v28 = vrot.slane %v269_v27, %v2644_v25  ;;  %v289_v32 = vrot.slane %v276_v30, %v2649_v29  ;;  %v284_v37 = vcombine.high %v276_v30, %v276_v30 }
 0x1cd   :  { %237 = vbcast.lane.b32.xlu1 %v231_v16, 264  ;;  %226 = vbcast.lane.b32.xlu0 %v220_v17, 264 }
 0x1ce   :  { %v293_v31 = vrot.slane %v283_v28, %v2649_v29  ;;  %v297_v47 = vrot.slane %v284_v37, %v2649_v29  ;;  %v285_v51 = vcombine.high %v283_v28, %v283_v28 }
 0x1d0   :  { %v301_v63 = vrot.slane %v285_v51, %v2649_v29 }
 0x1d1   :  { %248 = vbcast.lane.b32.xlu1 %v242_v19, 264  ;;  %244 = vbcast.lane.b32.xlu0 %v242_v19, 256 }
 0x1d5   :  { %259 = vbcast.lane.b32.xlu1 %v253_v21, 264  ;;  %255 = vbcast.lane.b32.xlu0 %v253_v21, 256 }
 0x23b   :  { %v234_v33 = vpop.permute.xlu1 %233  ;;  %v223_v34 = vpop.permute.xlu0 %222 }
 0x23c   :  { %v308_v35 = vadd.f32 %v293_v31, %v234_v33  ;;  %v306_v36 = vadd.f32 %v289_v32, %v223_v34 }
 0x23e   :  { %v316_v38 = vmul.f32 0.2, %v308_v35  ;;  %v314_v39 = vmul.f32 0.2, %v306_v36 }
 0x23f   :  { %v238_v40 = vpop.permute.xlu1 %237  ;;  %v227_v41 = vpop.permute.xlu0 %226 }
 0x240   :  { %v322_v43 = vmax.f32 %v306_v36, %v314_v39  ;;  %v309_v44 = vadd.f32 %v293_v31, %v238_v40  ;;  %v307_v45 = vadd.f32 %v289_v32, %v227_v41  ;;  %v324_v46 = vmax.f32 %v308_v35, %v316_v38 }
 0x242   :  { %v317_v48 = vmul.f32 0.2, %v309_v44  ;;  %v315_v49 = vmul.f32 0.2, %v307_v45  ;;  %v330_v50 = vadd.f32 %v322_v43, %v2657_v42  ;;  %v332_v60 = vadd.f32 %v324_v46, %v2657_v42 }
 0x243   :  { %v249_v52 = vpop.permute.xlu1 %248  ;;  %v245_v53 = vpop.permute.xlu0 %244 }
 0x244   :  { %v323_v55 = vmax.f32 %v307_v45, %v315_v49  ;;  %v311_v56 = vadd.f32 %v297_v47, %v249_v52  ;;  %v310_v57 = vadd.f32 %v297_v47, %v245_v53  ;;  %v325_v58 = vmax.f32 %v309_v44, %v317_v48 }
 0x245   :  { %v339_v59 = vsel %vm338_vm2, %v330_v50, -inf  ;;  %v345_v14 = vsel %vm338_vm2, %v332_v60, -inf }
 0x246   :  { %v319_v61 = vmul.f32 0.2, %v311_v56  ;;  %v318_v62 = vmul.f32 0.2, %v310_v57  ;;  %340 = vmax.xlane.f32.xlu0 %v339_v59  ;;  %v331_v0 = vadd.f32 %v323_v55, %v2664_v54  ;;  %v333_v15 = vadd.f32 %v325_v58, %v2664_v54 }
 0x247   :  { %v260_v1 = vpop.permute.xlu1 %259  ;;  %v256_v2 = vpop.permute.xlu0 %255 }
 0x248   :  { %v326_v5 = vmax.f32 %v310_v57, %v318_v62  ;;  %v313_v6 = vadd.f32 %v301_v63, %v260_v1  ;;  %v312_v7 = vadd.f32 %v301_v63, %v256_v2  ;;  %v327_v9 = vmax.f32 %v311_v56, %v319_v61 }
 0x249   :  { %v342_v10 = vsel %vm338_vm2, %v331_v0, -inf  ;;  %v348_v24 = vsel %vm338_vm2, %v333_v15, -inf }
 0x24a   :  { %v321_v16 = vmul.f32 0.2, %v313_v6  ;;  %v320_v17 = vmul.f32 0.2, %v312_v7  ;;  %343 = vmax.xlane.f32.xlu1 %v342_v10  ;;  %346 = vmax.xlane.f32.xlu0 %v345_v14  ;;  %v334_v19 = vadd.f32 %v326_v5, %v2657_v42  ;;  %v335_v26 = vadd.f32 %v327_v9, %v2664_v54 }
 0x24c   :  { %v328_v21 = vmax.f32 %v312_v7, %v320_v17  ;;  %v351_v22 = vsel %vm338_vm2, %v334_v19, -inf  ;;  %v329_v23 = vmax.f32 %v313_v6, %v321_v16  ;;  %v354_v30 = vsel %vm338_vm2, %v335_v26, -inf }
 0x24e   :  { %352 = vmax.xlane.f32.xlu1 %v351_v22  ;;  %349 = vmax.xlane.f32.xlu0 %v348_v24  ;;  %v336_v27 = vadd.f32 %v328_v21, %v2657_v42  ;;  %v337_v31 = vadd.f32 %v329_v23, %v2664_v54 }
 0x250   :  { %v357_v28 = vsel %vm338_vm2, %v336_v27, -inf  ;;  %v360_v32 = vsel %vm338_vm2, %v337_v31, -inf }
 0x252   :  { %358 = vmax.xlane.f32.xlu1 %v357_v28  ;;  %355 = vmax.xlane.f32.xlu0 %v354_v30 }
 0x256   :  { %361 = vmax.xlane.f32.xlu0 %v360_v32 }
 0x263   :  { %2393 = vrot.lane.b32.xlu1 %v2624_v8, %s2527_s30 }
 0x2d3   :  { %v341_v33 = vpop.xlane.xlu0 %340 }
 0x2d4   :  { %v363_v34 = vsub.f32 %v330_v50, %v341_v33 }
 0x2d6   :  { %v371_v35 = vmul.f32 1.442695, %v363_v34 }
 0x2d7   :  { %v344_v36 = vpop.xlane.xlu1 %343  ;;  %v347_v37 = vpop.xlane.xlu0 %346 }
 0x2d8   :  { %2422 = vpow2.f32 %v371_v35  ;;  %v364_v38 = vsub.f32 %v331_v0, %v344_v36  ;;  %v365_v39 = vsub.f32 %v332_v60, %v347_v37 }
 0x2da   :  { %v373_v40 = vmul.f32 1.442695, %v364_v38  ;;  %v375_v41 = vmul.f32 1.442695, %v365_v39 }
 0x2db   :  { %v353_v43 = vpop.xlane.xlu1 %352  ;;  %v350_v44 = vpop.xlane.xlu0 %349 }
 0x2dc   :  { %2424 = vpow2.f32 %v373_v40  ;;  %v367_v45 = vsub.f32 %v334_v19, %v353_v43  ;;  %v366_v46 = vsub.f32 %v333_v15, %v350_v44 }
 0x2dd   :  { %2426 = vpow2.f32 %v375_v41 }
 0x2de   :  { %v379_v47 = vmul.f32 1.442695, %v367_v45  ;;  %v377_v48 = vmul.f32 1.442695, %v366_v46 }
 0x2df   :  { %v359_v49 = vpop.xlane.xlu1 %358  ;;  %v356_v51 = vpop.xlane.xlu0 %355 }
 0x2e0   :  { %2428 = vpow2.f32 %v379_v47  ;;  %v369_v50 = vsub.f32 %v336_v27, %v359_v49  ;;  %v368_v52 = vsub.f32 %v335_v26, %v356_v51 }
 0x2e1   :  { %2430 = vpow2.f32 %v377_v48 }
 0x2e2   :  { %v2423_v53 = vpop.eup %2422  ;;  %v383_v55 = vmul.f32 1.442695, %v369_v50  ;;  %v381_v56 = vmul.f32 1.442695, %v368_v52 }
 0x2e3   :  { %v2394_v57 = vpop.permute.xlu1 %2393  ;;  %v362_v58 = vpop.xlane.xlu0 %361  ;;  %v387_v59 = vsel %vm338_vm2, %v2423_v53, 0.0 }
 0x2e4   :  { %2432 = vpow2.f32 %v383_v55  ;;  %v2396_v60 = vunpack.i.h.bf16 %v2394_v57  ;;  %v2395_v61 = vunpack.i.l.bf16 %v2394_v57  ;;  %v370_v62 = vsub.f32 %v337_v31, %v362_v58  ;;  %388 = vadd.xlane.f32.xlu1 %v387_v59  ;;  %v814_v58 = vld [vmem:[%s2897_s5] sm:$0xff]  ;;  %v815_v59 = vld [vmem:[%s2897_s5 + $0x8] sm:$0xff] }
 0x2e5   :  { %2434 = vpow2.f32 %v381_v56 }
 0x2e6   :  { %v2425_v63 = vpop.eup %2424  ;;  %v2271_v0 = vpack.c.bf16 %v2396_v60, %v2395_v61  ;;  %v385_v1 = vmul.f32 1.442695, %v370_v62  ;;  %v816_v60 = vld [vmem:[%s2897_s5 + $0x10] sm:$0xff]  ;;  %v2283_v61 = vpack.c.bf16 %v815_v59, %v814_v58  ;;  %v817_v62 = vld [vmem:[%s2897_s5 + $0x18] sm:$0xff] }
 0x2e7   :  { %v2427_v2 = vpop.eup %2426  ;;  %v390_v5 = vsel %vm338_vm2, %v2425_v63, 0.0 }
 0x2e8   :  { %2436 = vpow2.f32 %v385_v1  ;;  %2272 = vmatprep.subr.bf16.mxu0 %v2271_v0  ;;  %391 = vadd.xlane.f32.xlu0 %v390_v5  ;;  %v393_v6 = vsel %vm338_vm2, %v2427_v2, 0.0  ;;  %v819_v1 = vld [vmem:[%s2897_s5 + $0x28] sm:$0xff]  ;;  %v820_v5 = vld [vmem:[%s2897_s5 + $0x30] sm:$0xff] }
 0x2e9   :  { %394 = vadd.xlane.f32.xlu1 %v393_v6  ;;  %v821_v6 = vld [vmem:[%s2897_s5 + $0x38] sm:$0xff] }
 0x2ea   :  { %v2429_v7 = vpop.eup %2428 }
 0x2eb   :  { %v2431_v9 = vpop.eup %2430  ;;  %v399_v10 = vsel %vm338_vm2, %v2429_v7, 0.0 }
 0x2ec   :  { %v396_v14 = vsel %vm338_vm2, %v2431_v9, 0.0 }
 0x2ed   :  { %400 = vadd.xlane.f32.xlu1 %v399_v10  ;;  %397 = vadd.xlane.f32.xlu0 %v396_v14  ;;  %v823_v10 = vld [vmem:[%s2897_s5 + $0x48] sm:$0xff] }
 0x2ee   :  { %v2433_v15 = vpop.eup %2432 }
 0x2ef   :  { %v2435_v16 = vpop.eup %2434  ;;  %v405_v17 = vsel %vm338_vm2, %v2433_v15, 0.0 }
 0x2f0   :  { %v402_v19 = vsel %vm338_vm2, %v2435_v16, 0.0 }
 0x2f1   :  { %406 = vadd.xlane.f32.xlu1 %v405_v17  ;;  %403 = vadd.xlane.f32.xlu0 %v402_v19  ;;  %v825_v17 = vld [vmem:[%s2897_s5 + $0x58] sm:$0xff] }
 0x2f2   :  { %v2437_v21 = vpop.eup %2436 }
 0x2f3   :  { %v408_v22 = vsel %vm338_vm2, %v2437_v21, 0.0 }
 0x2f5   :  { %409 = vadd.xlane.f32.xlu0 %v408_v22  ;;  %v826_v22 = vld [vmem:[%s2897_s5 + $0x60] sm:$0xff] }
 0x302   :  { %2403 = vrot.lane.b32.xlu1 %v2624_v8, %s2528_s14 }
 0x30b   :  { %2398 = vrot.lane.b32.xlu0 %v2624_v8, %s2529_s15 }
 0x371   :  { %v389_v23 = vpop.xlane.xlu1 %388 }
 0x372   :  { %2438 = vrcp.f32 %v389_v23  ;;  %v827_v23 = vld [vmem:[%s2897_s5 + $0x68] sm:$0xff] }
 0x375   :  { %v392_v24 = vpop.xlane.xlu0 %391 }
 0x376   :  { %v395_v26 = vpop.xlane.xlu1 %394  ;;  %2440 = vrcp.f32 %v392_v24 }
 0x377   :  { %2442 = vrcp.f32 %v395_v26  ;;  %v2307_v26 = vpack.c.bf16 %v827_v23, %v826_v22 }
 0x37a   :  { %v401_v27 = vpop.xlane.xlu1 %400  ;;  %v398_v28 = vpop.xlane.xlu0 %397 }
 0x37b   :  { %2444 = vrcp.f32 %v401_v27 }
 0x37c   :  { %v2439_v30 = vpop.eup %2438  ;;  %2446 = vrcp.f32 %v398_v28  ;;  %v828_v28 = vld [vmem:[%s2897_s5 + $0x70] sm:$0xff] }
 0x37d   :  { %v419_v31 = vmul.f32 %v2439_v30, %v2423_v53  ;;  %v829_v30 = vld [vmem:[%s2897_s5 + $0x78] sm:$0xff] }
 0x37e   :  { %v407_v32 = vpop.xlane.xlu1 %406  ;;  %v404_v33 = vpop.xlane.xlu0 %403 }
 0x37f   :  { %2448 = vrcp.f32 %v407_v32  ;;  %2110 = vmatprep.mubr.msk.f32.mxu0 %vm338_vm2, %v419_v31  ;;  %v2311_v31 = vpack.c.bf16 %v829_v30, %v828_v28 }
 0x380   :  { %v2441_v34 = vpop.eup %2440  ;;  %2450 = vrcp.f32 %v404_v33 }
 0x381   :  { %v2443_v8 = vpop.eup %2442  ;;  %v420_v35 = vmul.f32 %v2441_v34, %v2425_v63  ;;  %v2287_v63 = vpack.c.bf16 %v817_v62, %v816_v60 }
 0x382   :  { %v2404_v36 = vpop.permute.xlu1 %2403  ;;  %v410_v37 = vpop.xlane.xlu0 %409  ;;  %v421_v38 = vmul.f32 %v2443_v8, %v2427_v2 }
 0x383   :  { %v2406_v39 = vunpack.i.h.bf16 %v2404_v36  ;;  %v2405_v40 = vunpack.i.l.bf16 %v2404_v36  ;;  %2452 = vrcp.f32 %v410_v37  ;;  %2111 = vmatmul.mubr.msk.f32.vlgmr.msra.gmra.mrb[0].mxu0 %vm338_vm2, %v420_v35 }
 0x384   :  { %2274 = vmatpush3.bf16.msra.mxu0 %v2271_v0  ;;  %2117 = vmatprep.mubr.msk.f32.mxu0 %vm338_vm2, %v421_v38  ;;  %v818_v0 = vld [vmem:[%s2897_s5 + $0x20] sm:$0xff] }
 0x385   :  { %v2445_v41 = vpop.eup %2444  ;;  %v2279_v43 = vpack.c.bf16 %v2406_v39, %v2405_v40  ;;  %v2291_v2 = vpack.c.bf16 %v819_v1, %v818_v0 }
 0x386   :  { %v2447_v44 = vpop.eup %2446  ;;  %v2399_v45 = vpop.permute.xlu0 %2398  ;;  %v423_v46 = vmul.f32 %v2445_v41, %v2429_v7  ;;  %v2295_v7 = vpack.c.bf16 %v821_v6, %v820_v5 }
 0x387   :  { %v422_v47 = vmul.f32 %v2447_v44, %v2431_v9  ;;  %v2401_v48 = vunpack.i.h.bf16 %v2399_v45  ;;  %v2400_v49 = vunpack.i.l.bf16 %v2399_v45  ;;  %2280 = vmatprep.subr.bf16.mxu0 %v2279_v43  ;;  %v822_v9 = vld [vmem:[%s2897_s5 + $0x40] sm:$0xff] }
 0x388   :  { %2124 = vmatprep.mubr.msk.f32.mxu1 %vm338_vm2, %v423_v46  ;;  %v2299_v14 = vpack.c.bf16 %v823_v10, %v822_v9 }
 0x389   :  { %v2449_v51 = vpop.eup %2448  ;;  %v2275_v50 = vpack.c.bf16 %v2401_v48, %v2400_v49  ;;  %2118 = vmatmul.mubr.msk.f32.vlgmr.msra.gmra.mrb[2].mxu0 %vm338_vm2, %v422_v47 }
 0x38a   :  { %v2451_v52 = vpop.eup %2450  ;;  %2282 = vmatpush3.bf16.msra.mxu0 %v2279_v43  ;;  %v425_v53 = vmul.f32 %v2449_v51, %v2433_v15 }
 0x38b   :  { %2276 = vmatprep.subr.bf16.mxu1 %v2275_v50  ;;  %2315 = vmatprep.subr.bf16.mxu0 %v2523_v3  ;;  %v424_v56 = vmul.f32 %v2451_v52, %v2435_v16  ;;  %v824_v16 = vld [vmem:[%s2897_s5 + $0x50] sm:$0xff] }
 0x38c   :  { %2278 = vmatpush3.bf16.msra.mxu1 %v2275_v50  ;;  %2131 = vmatprep.mubr.msk.f32.mxu0 %vm338_vm2, %v425_v53 }
 0x38d   :  { %v2453_v55 = vpop.eup %2452  ;;  %2284 = vmatprep.subr.bf16.mxu1 %v2283_v61 }
 0x38e   :  { %v426_v57 = vmul.f32 %v2453_v55, %v2437_v21  ;;  %v2303_v21 = vpack.c.bf16 %v825_v17, %v824_v16 }
 0x38f   :  { %2125 = vmatmul.mubr.msk.f32.vlgmr.msra.gmra.mrb[4].mxu1 %vm338_vm2, %v424_v56 }
 0x390   :  { %2132 = vmatmul.mubr.msk.f32.vlgmr.msra.gmra.mrb[4].mxu0 %vm338_vm2, %v426_v57  ;;  %2286 = vmatpush3.bf16.msra.mxu1 %v2283_v61  ;;  %v830_v57 = vld [vmem:[%s2898_s6] sm:$0xff] }
 0x391   :  { %2173 = vmatprep.mubr.msk.f32.mxu0 %vm2524_vm1, %v2525_v4  ;;  %2288 = vmatprep.subr.bf16.mxu1 %v2287_v63 }
 0x394   :  { %2290 = vmatpush3.bf16.msra.mxu1 %v2287_v63 }
 0x395   :  { %2292 = vmatprep.subr.bf16.mxu1 %v2291_v2 }
 0x398   :  { %2294 = vmatpush3.bf16.msra.mxu1 %v2291_v2 }
 0x399   :  { %2296 = vmatprep.subr.bf16.mxu1 %v2295_v7 }
 0x39c   :  { %2298 = vmatpush3.bf16.msra.mxu1 %v2295_v7 }
 0x39d   :  { %2300 = vmatprep.subr.bf16.mxu1 %v2299_v14 }
 0x3a0   :  { %2302 = vmatpush3.bf16.msra.mxu1 %v2299_v14 }
 0x3a1   :  { %2304 = vmatprep.subr.bf16.mxu1 %v2303_v21 }
 0x3a4   :  { %2306 = vmatpush3.bf16.msra.mxu1 %v2303_v21 }
 0x3a5   :  { %2308 = vmatprep.subr.bf16.mxu1 %v2307_v26 }
 0x3a8   :  { %2310 = vmatpush3.bf16.msra.mxu1 %v2307_v26 }
 0x3a9   :  { %2312 = vmatprep.subr.bf16.mxu1 %v2311_v31 }
 0x3ac   :  { %2314 = vmatpush3.bf16.msra.mxu1 %v2311_v31 }
 0x3ad   :  { %2366 = vmatprep.subr.bf16.mxu1 %v2523_v3  ;;  %v1985_v3 = vld [vmem:[%s2896_s4] ss:$0 sm:$0xff] }
 0x456   :  { %v2112_v15 = vpop.f32.mrb[0].mxu0 }
 0x457   :  { %v499_v19 = vpop.f32.mrb[1].mxu0 }
 0x45c   :  { %v2119_v24 = vpop.f32.mrb[2].mxu0 }
 0x45d   :  { %v588_v27 = vpop.f32.mrb[3].mxu0 }
 0x462   :  { %v2126_v32 = vpop.f32.mrb[4].mxu1 }
 0x463   :  { %v2133_v33 = vpop.f32.mrb[4].mxu0  ;;  %783 = vrot.lane.b32.xlu0 %v2126_v32, %s2529_s15  ;;  %v675_v34 = vpop.f32.mrb[5].mxu1 }
 0x464   :  { %v762_v8 = vpop.f32.mrb[5].mxu0  ;;  %781 = vrot.lane.b32.xlu1 %v675_v34, %s2529_s15 }
 0x467   :  { %775 = vrot.lane.b32.xlu0 %v2119_v24, %s2528_s14 }
 0x468   :  { %773 = vrot.lane.b32.xlu1 %v588_v27, %s2528_s14 }
 0x46b   :  { %791 = vrot.lane.b32.xlu0 %v2133_v33, %s2527_s30 }
 0x46c   :  { %789 = vrot.lane.b32.xlu1 %v762_v8, %s2527_s30 }
 0x4d5   :  { %v784_v35 = vpop.permute.xlu0 %783 }
 0x4d6   :  { %v782_v36 = vpop.permute.xlu1 %781 }
 0x4d9   :  { %v776_v37 = vpop.permute.xlu0 %775 }
 0x4da   :  { %v797_v38 = vsel %vm795_vm3, %v2112_v15, %v776_v37  ;;  %v774_v39 = vpop.permute.xlu1 %773 }
 0x4db   :  { %v796_v40 = vsel %vm795_vm3, %v499_v19, %v774_v39  ;;  %v800_v41 = vsel %vm798_vm4, %v797_v38, %v784_v35 }
 0x4dc   :  { %v799_v45 = vsel %vm798_vm4, %v796_v40, %v782_v36 }
 0x4dd   :  { %v792_v43 = vpop.permute.xlu0 %791 }
 0x4de   :  { %v803_v44 = vsel %vm801_vm5, %v800_v41, %v792_v43  ;;  %v790_v46 = vpop.permute.xlu1 %789 }
 0x4df   :  { %v811_v47 = vadd.f32 %v1985_v3, %v803_v44  ;;  %v802_v48 = vsel %vm801_vm5, %v799_v45, %v790_v46 }
 0x4e0   :  { %v810_v49 = vadd.f32 %v1985_v3, %v802_v48 }
 0x4e1   :  { %v813_v50 = vmax.f32 %v811_v47, 0.0 }
 0x4e2   :  { %v812_v51 = vmax.f32 %v810_v49, 0.0 }
 0x4e4   :  { %2166 = vmatprep.mubr.f32.mxu1 %v812_v51 }
 0x4e5   :  { %2167 = vmatmul.mubr.f32.vlgmr.msra.gmra.mrb[6].mxu1 %v813_v50 }
 0x4e6   :  { %2243 = vmatprep.mubr.msk.f32.mxu1 %vm2524_vm1, %v2525_v4 }
 0x5b8   :  { %v2168_v52 = vpop.f32.mrb[6].mxu1 }
 0x5b9   :  { %v898_v53 = vpop.f32.mrb[7].mxu1 }
 0x5ba   :  { %v2316_v55 = vpack.c.bf16 %v2168_v52, %v898_v53  ;;  %v2773_v56 = vpack.i.bf16 %v2168_v52, %v898_v53 }
 0x5bc   :  { %2317 = vmatpush3.bf16.xpose.msra.mxu0 %v2316_v55 }
 0x5bd   :  { %2319 = vmatprep.subr.bf16.mxu0 %v2316_v55 }
 0x5c3   :  { %2174 = vmatmul.mubr.f32.vlgmr.msra.gmra.mrb[6].mxu0 %v830_v57 }
 0x5c4   :  { %2321 = vmatpush3.bf16.msra.mxu0 %v2316_v55 }
 0x696   :  { %v973_v58 = vpop.f32.mrb[6].mxu0 }
 0x697   :  { %v2175_v59 = vpop.f32.mrb[7].mxu0  ;;  %v980_v60 = vrot.slane %v973_v58, %v219_v13  ;;  %v991_v4 = vrot.slane %v973_v58, %v230_v12  ;;  %v1002_v61 = vrot.slane %v973_v58, %v241_v18  ;;  %v1013_v62 = vrot.slane %v973_v58, %v252_v20 }
 0x698   :  { %v1028_v63 = vrot.slane %v973_v58, %v2644_v25 }
 0x699   :  { %986 = vbcast.lane.b32.xlu0 %v980_v60, 264  ;;  %982 = vbcast.lane.b32.xlu1 %v980_v60, 256 }
 0x69a   :  { %v1036_v13 = vrot.slane %v1028_v63, %v2644_v25  ;;  %v1029_v0 = vcombine.high %v1028_v63, %v1028_v63 }
 0x69c   :  { %v1049_v1 = vrot.slane %v1036_v13, %v2649_v29  ;;  %v1043_v12 = vrot.slane %v1029_v0, %v2644_v25  ;;  %v1044_v7 = vcombine.high %v1036_v13, %v1036_v13 }
 0x69d   :  { %997 = vbcast.lane.b32.xlu0 %v991_v4, 264  ;;  %993 = vbcast.lane.b32.xlu1 %v991_v4, 256 }
 0x69e   :  { %v1053_v20 = vrot.slane %v1043_v12, %v2649_v29  ;;  %v1057_v22 = vrot.slane %v1044_v7, %v2649_v29  ;;  %v1045_v23 = vcombine.high %v1043_v12, %v1043_v12 }
 0x6a0   :  { %v1061_v36 = vrot.slane %v1045_v23, %v2649_v29 }
 0x6a1   :  { %1008 = vbcast.lane.b32.xlu0 %v1002_v61, 264  ;;  %1004 = vbcast.lane.b32.xlu1 %v1002_v61, 256 }
 0x6a5   :  { %1019 = vbcast.lane.b32.xlu0 %v1013_v62, 264  ;;  %1015 = vbcast.lane.b32.xlu1 %v1013_v62, 256 }
 0x70b   :  { %v987_v2 = vpop.permute.xlu0 %986  ;;  %v983_v5 = vpop.permute.xlu1 %982 }
 0x70c   :  { %v1067_v6 = vadd.f32 %v1049_v1, %v987_v2  ;;  %v1066_v18 = vadd.f32 %v1049_v1, %v983_v5 }
 0x70e   :  { %v1075_v9 = vmul.f32 0.2, %v1067_v6  ;;  %v1074_v10 = vmul.f32 0.2, %v1066_v18 }
 0x70f   :  { %v998_v14 = vpop.permute.xlu0 %997  ;;  %v994_v15 = vpop.permute.xlu1 %993 }
 0x710   :  { %v1083_v16 = vmax.f32 %v1067_v6, %v1075_v9  ;;  %v1082_v17 = vmax.f32 %v1066_v18, %v1074_v10  ;;  %v1069_v19 = vadd.f32 %v1053_v20, %v998_v14  ;;  %v1068_v21 = vadd.f32 %v1053_v20, %v994_v15 }
 0x712   :  { %v1077_v24 = vmul.f32 0.2, %v1069_v19  ;;  %v1076_v25 = vmul.f32 0.2, %v1068_v21  ;;  %v1091_v26 = vadd.f32 %v1083_v16, %v2664_v54  ;;  %v1090_v27 = vadd.f32 %v1082_v17, %v2657_v42 }
 0x713   :  { %v1009_v28 = vpop.permute.xlu0 %1008  ;;  %v1005_v30 = vpop.permute.xlu1 %1004 }
 0x714   :  { %v1085_v31 = vmax.f32 %v1069_v19, %v1077_v24  ;;  %v1084_v32 = vmax.f32 %v1068_v21, %v1076_v25  ;;  %v1071_v33 = vadd.f32 %v1057_v22, %v1009_v28  ;;  %v1070_v34 = vadd.f32 %v1057_v22, %v1005_v30 }
 0x715   :  { %v1101_v8 = vsel %vm338_vm2, %v1091_v26, -inf  ;;  %v1098_v35 = vsel %vm338_vm2, %v1090_v27, -inf }
 0x716   :  { %v1079_v37 = vmul.f32 0.2, %v1071_v33  ;;  %v1078_v38 = vmul.f32 0.2, %v1070_v34  ;;  %1102 = vmax.xlane.f32.xlu0 %v1101_v8  ;;  %1099 = vmax.xlane.f32.xlu1 %v1098_v35  ;;  %v1093_v39 = vadd.f32 %v1085_v31, %v2664_v54  ;;  %v1092_v40 = vadd.f32 %v1084_v32, %v2657_v42 }
 0x717   :  { %v1020_v3 = vpop.permute.xlu0 %1019  ;;  %v1016_v41 = vpop.permute.xlu1 %1015 }
 0x718   :  { %v1087_v43 = vmax.f32 %v1071_v33, %v1079_v37  ;;  %v1086_v44 = vmax.f32 %v1070_v34, %v1078_v38  ;;  %v1073_v45 = vadd.f32 %v1061_v36, %v1020_v3  ;;  %v1072_v46 = vadd.f32 %v1061_v36, %v1016_v41 }
 0x719   :  { %v1107_v47 = vsel %vm338_vm2, %v1093_v39, -inf  ;;  %v1104_v48 = vsel %vm338_vm2, %v1092_v40, -inf }
 0x71a   :  { %v1081_v49 = vmul.f32 0.2, %v1073_v45  ;;  %v1080_v51 = vmul.f32 0.2, %v1072_v46  ;;  %1108 = vmax.xlane.f32.xlu1 %v1107_v47  ;;  %1105 = vmax.xlane.f32.xlu0 %v1104_v48  ;;  %v1095_v50 = vadd.f32 %v1087_v43, %v2664_v54  ;;  %v1094_v52 = vadd.f32 %v1086_v44, %v2657_v42 }
 0x71c   :  { %v1089_v53 = vmax.f32 %v1073_v45, %v1081_v49  ;;  %v1088_v55 = vmax.f32 %v1072_v46, %v1080_v51  ;;  %v1113_v57 = vsel %vm338_vm2, %v1095_v50, -inf  ;;  %v1110_v58 = vsel %vm338_vm2, %v1094_v52, -inf }
 0x71e   :  { %1114 = vmax.xlane.f32.xlu1 %v1113_v57  ;;  %1111 = vmax.xlane.f32.xlu0 %v1110_v58  ;;  %v1097_v59 = vadd.f32 %v1089_v53, %v2664_v54  ;;  %v1096_v60 = vadd.f32 %v1088_v55, %v2657_v42 }
 0x720   :  { %v1119_v4 = vsel %vm338_vm2, %v1097_v59, -inf  ;;  %v1116_v61 = vsel %vm338_vm2, %v1096_v60, -inf }
 0x722   :  { %1120 = vmax.xlane.f32.xlu1 %v1119_v4  ;;  %1117 = vmax.xlane.f32.xlu0 %v1116_v61 }
 0x7a3   :  { %v1103_v62 = vpop.xlane.xlu0 %1102  ;;  %v1100_v63 = vpop.xlane.xlu1 %1099 }
 0x7a4   :  { %v1123_v13 = vsub.f32 %v1091_v26, %v1103_v62  ;;  %v1122_v0 = vsub.f32 %v1090_v27, %v1100_v63 }
 0x7a6   :  { %v1132_v1 = vmul.f32 1.442695, %v1123_v13  ;;  %v1130_v12 = vmul.f32 1.442695, %v1122_v0 }
 0x7a7   :  { %v1106_v2 = vpop.xlane.xlu0 %1105  ;;  %v1109_v5 = vpop.xlane.xlu1 %1108 }
 0x7a8   :  { %2454 = vpow2.f32 %v1132_v1  ;;  %v1124_v6 = vsub.f32 %v1092_v40, %v1106_v2  ;;  %v1125_v18 = vsub.f32 %v1093_v39, %v1109_v5 }
 0x7a9   :  { %2456 = vpow2.f32 %v1130_v12 }
 0x7aa   :  { %v1134_v54 = vmul.f32 1.442695, %v1124_v6  ;;  %v1136_v42 = vmul.f32 1.442695, %v1125_v18 }
 0x7ab   :  { %v1112_v7 = vpop.xlane.xlu0 %1111  ;;  %v1115_v9 = vpop.xlane.xlu1 %1114 }
 0x7ac   :  { %2458 = vpow2.f32 %v1134_v54  ;;  %v1126_v10 = vsub.f32 %v1094_v52, %v1112_v7  ;;  %v1127_v20 = vsub.f32 %v1095_v50, %v1115_v9 }
 0x7ad   :  { %2460 = vpow2.f32 %v1136_v42 }
 0x7ae   :  { %v1138_v14 = vmul.f32 1.442695, %v1126_v10  ;;  %v1140_v15 = vmul.f32 1.442695, %v1127_v20 }
 0x7af   :  { %v1118_v16 = vpop.xlane.xlu0 %1117  ;;  %v1121_v35 = vpop.xlane.xlu1 %1120 }
 0x7b0   :  { %2462 = vpow2.f32 %v1138_v14  ;;  %v1128_v17 = vsub.f32 %v1096_v60, %v1118_v16  ;;  %v1129_v36 = vsub.f32 %v1097_v59, %v1121_v35  ;;  %v1570_v14 = vld [vmem:[#allocation2] sm:$0xff]  ;;  %v1572_v16 = vld [vmem:[#allocation2 + $0x10] sm:$0xff] }
 0x7b1   :  { %2464 = vpow2.f32 %v1140_v15  ;;  %v1571_v15 = vld [vmem:[#allocation2 + $0x8] sm:$0xff]  ;;  %v1580_v35 = vld [vmem:[#allocation2 + $0x50] sm:$0xff] }
 0x7b2   :  { %v2455_v19 = vpop.eup %2454  ;;  %v1142_v21 = vmul.f32 1.442695, %v1128_v17  ;;  %v1144_v37 = vmul.f32 1.442695, %v1129_v36  ;;  %v2334_v17 = vpack.c.bf16 %v1571_v15, %v1570_v14  ;;  %v1581_v36 = vld [vmem:[#allocation2 + $0x58] sm:$0xff] }
 0x7b3   :  { %v2457_v22 = vpop.eup %2456  ;;  %v1149_v23 = vsel %vm338_vm2, %v2455_v19, 0.0 }
 0x7b4   :  { %2466 = vpow2.f32 %v1142_v21  ;;  %1150 = vadd.xlane.f32.xlu1 %v1149_v23  ;;  %v1146_v24 = vsel %vm338_vm2, %v2457_v22, 0.0  ;;  %v1575_v23 = vld [vmem:[#allocation2 + $0x28] sm:$0xff] }
 0x7b5   :  { %1147 = vadd.xlane.f32.xlu0 %v1146_v24  ;;  %2468 = vpow2.f32 %v1144_v37  ;;  %v2354_v37 = vpack.c.bf16 %v1581_v36, %v1580_v35 }
 0x7b6   :  { %v2459_v25 = vpop.eup %2458 }
 0x7b7   :  { %v2461_v26 = vpop.eup %2460  ;;  %v1152_v27 = vsel %vm338_vm2, %v2459_v25, 0.0 }
 0x7b8   :  { %v1155_v28 = vsel %vm338_vm2, %v2461_v26, 0.0 }
 0x7b9   :  { %1153 = vadd.xlane.f32.xlu0 %v1152_v27  ;;  %1156 = vadd.xlane.f32.xlu1 %v1155_v28 }
 0x7ba   :  { %v2463_v30 = vpop.eup %2462 }
 0x7bb   :  { %v2465_v31 = vpop.eup %2464  ;;  %v1158_v32 = vsel %vm338_vm2, %v2463_v30, 0.0 }
 0x7bc   :  { %v1161_v33 = vsel %vm338_vm2, %v2465_v31, 0.0 }
 0x7bd   :  { %1159 = vadd.xlane.f32.xlu0 %v1158_v32  ;;  %1162 = vadd.xlane.f32.xlu1 %v1161_v33  ;;  %v1579_v32 = vld [vmem:[#allocation2 + $0x48] sm:$0xff] }
 0x7be   :  { %v2467_v34 = vpop.eup %2466 }
 0x7bf   :  { %v1164_v8 = vsel %vm338_vm2, %v2467_v34, 0.0  ;;  %v2469_v38 = vpop.eup %2468 }
 0x7c0   :  { %v1167_v39 = vsel %vm338_vm2, %v2469_v38, 0.0 }
 0x7c1   :  { %1165 = vadd.xlane.f32.xlu0 %v1164_v8 }
 0x7ce   :  { %2413 = vrot.lane.b32.xlu1 %v2773_v56, %s2529_s15 }
 0x7d7   :  { %2408 = vrot.lane.b32.xlu0 %v2773_v56, %s2527_s30 }
 0x7f2   :  { %1168 = vadd.xlane.f32.xlu1 %v1167_v39  ;;  %v1583_v39 = vld [vmem:[#allocation2 + $0x68] sm:$0xff] }
 0x803   :  { %2418 = vrot.lane.b32.xlu1 %v2773_v56, %s2528_s14 }
 0x841   :  { %v1151_v40 = vpop.xlane.xlu1 %1150 }
 0x842   :  { %v1148_v3 = vpop.xlane.xlu0 %1147  ;;  %2470 = vrcp.f32 %v1151_v40 }
 0x843   :  { %2472 = vrcp.f32 %v1148_v3  ;;  %v1584_v3 = vld [vmem:[#allocation2 + $0x70] sm:$0xff] }
 0x846   :  { %v1154_v41 = vpop.xlane.xlu0 %1153  ;;  %v1157_v43 = vpop.xlane.xlu1 %1156 }
 0x847   :  { %2474 = vrcp.f32 %v1154_v41  ;;  %v1585_v41 = vld [vmem:[#allocation2 + $0x78] sm:$0xff] }
 0x848   :  { %2476 = vrcp.f32 %v1157_v43  ;;  %v2362_v43 = vpack.c.bf16 %v1585_v41, %v1584_v3  ;;  %v1878_v3 = vld [vmem:[%s2903_s11 + $0x10] sm:$0xff]  ;;  %v1879_v41 = vld [vmem:[%s2903_s11 + $0x18] sm:$0xff] }
 0x84a   :  { %v1160_v44 = vpop.xlane.xlu0 %1159  ;;  %v1163_v45 = vpop.xlane.xlu1 %1162 }
 0x84b   :  { %2478 = vrcp.f32 %v1160_v44 }
 0x84c   :  { %v2471_v46 = vpop.eup %2470  ;;  %2480 = vrcp.f32 %v1163_v45 }
 0x84d   :  { %v2473_v47 = vpop.eup %2472  ;;  %v1179_v48 = vmul.f32 %v2471_v46, %v2455_v19  ;;  %v1573_v19 = vld [vmem:[#allocation2 + $0x18] sm:$0xff] }
 0x84e   :  { %v1166_v49 = vpop.xlane.xlu0 %1165  ;;  %v1178_v51 = vmul.f32 %v2473_v47, %v2457_v22  ;;  %v2414_v50 = vpop.permute.xlu1 %2413  ;;  %v2338_v21 = vpack.c.bf16 %v1573_v19, %v1572_v16  ;;  %v1574_v22 = vld [vmem:[#allocation2 + $0x20] sm:$0xff]  ;;  %v2494_v16 = vld [vmem:[%s2893_s1 + $0x8] sm:$0xff] }
 0x84f   :  { %2482 = vrcp.f32 %v1166_v49  ;;  %v2416_v55 = vunpack.i.h.bf16 %v2414_v50  ;;  %v2415_v57 = vunpack.i.l.bf16 %v2414_v50  ;;  %v2342_v24 = vpack.c.bf16 %v1575_v23, %v1574_v22  ;;  %v1994_v50 = vld [vmem:[%s2899_s7] ss:$0 sm:$0xff] }
 0x850   :  { %2180 = vmatprep.mubr.msk.f32.mxu0 %vm338_vm2, %v1178_v51 }
 0x851   :  { %v2475_v56 = vpop.eup %2474  ;;  %2181 = vmatmul.mubr.msk.f32.vlgmr.msra.gmra.mrb[8].mxu0 %vm338_vm2, %v1179_v48  ;;  %v2326_v62 = vpack.c.bf16 %v2416_v55, %v2415_v57 }
 0x852   :  { %v2409_v52 = vpop.permute.xlu0 %2408  ;;  %v1180_v53 = vmul.f32 %v2475_v56, %v2459_v25  ;;  %v2477_v4 = vpop.eup %2476  ;;  %v1576_v25 = vld [vmem:[#allocation2 + $0x30] sm:$0xff] }
 0x853   :  { %v2411_v58 = vunpack.i.h.bf16 %v2409_v52  ;;  %v2410_v59 = vunpack.i.l.bf16 %v2409_v52  ;;  %v1181_v63 = vmul.f32 %v2477_v4, %v2461_v26  ;;  %v1577_v26 = vld [vmem:[#allocation2 + $0x38] sm:$0xff] }
 0x854   :  { %2187 = vmatprep.mubr.msk.f32.mxu0 %vm338_vm2, %v1180_v53 }
 0x855   :  { %v2322_v60 = vpack.c.bf16 %v2411_v58, %v2410_v59  ;;  %v2479_v61 = vpop.eup %2478 }
 0x856   :  { %v2481_v13 = vpop.eup %2480  ;;  %v1182_v0 = vmul.f32 %v2479_v61, %v2463_v30  ;;  %v2346_v30 = vpack.c.bf16 %v1577_v26, %v1576_v25 }
 0x857   :  { %2323 = vmatprep.subr.bf16.mxu0 %v2322_v60  ;;  %v1183_v12 = vmul.f32 %v2481_v13, %v2465_v31  ;;  %v1578_v31 = vld [vmem:[#allocation2 + $0x40] sm:$0xff] }
 0x858   :  { %2325 = vmatpush3.bf16.msra.mxu0 %v2322_v60  ;;  %v2350_v8 = vpack.c.bf16 %v1579_v32, %v1578_v31 }
 0x859   :  { %2327 = vmatprep.subr.bf16.mxu0 %v2326_v62  ;;  %v2483_v1 = vpop.eup %2482 }
 0x85a   :  { %v1184_v2 = vmul.f32 %v2483_v1, %v2467_v34  ;;  %v1586_v1 = vld [vmem:[%s2901_s9] sm:$0x3] }
 0x85b   :  { %2188 = vmatmul.mubr.msk.f32.vlgmr.msra.gmra.mrb[10].mxu0 %vm338_vm2, %v1181_v63 }
 0x85c   :  { %2329 = vmatpush3.bf16.msra.mxu0 %v2326_v62  ;;  %2194 = vmatprep.mubr.msk.f32.mxu0 %vm338_vm2, %v1182_v0 }
 0x85f   :  { %2195 = vmatmul.mubr.msk.f32.vlgmr.msra.gmra.mrb[12].mxu0 %vm338_vm2, %v1183_v12  ;;  %v1744_v12 = vsub.s32 1, %v2629_v11 }
 0x860   :  { %2201 = vmatprep.mubr.msk.f32.mxu0 %vm338_vm2, %v1184_v2 }
 0x87f   :  { %v1169_v5 = vpop.xlane.xlu1 %1168 }
 0x880   :  { %2484 = vrcp.f32 %v1169_v5 }
 0x883   :  { %v2419_v6 = vpop.permute.xlu1 %2418 }
 0x884   :  { %v2421_v18 = vunpack.i.h.bf16 %v2419_v6  ;;  %v2420_v54 = vunpack.i.l.bf16 %v2419_v6 }
 0x886   :  { %v2330_v42 = vpack.c.bf16 %v2421_v18, %v2420_v54 }
 0x888   :  { %2331 = vmatprep.subr.bf16.mxu0 %v2330_v42 }
 0x889   :  { %2333 = vmatpush3.bf16.msra.mxu0 %v2330_v42 }
 0x88a   :  { %v2485_v7 = vpop.eup %2484  ;;  %2335 = vmatprep.subr.bf16.mxu0 %v2334_v17 }
 0x88b   :  { %v1185_v9 = vmul.f32 %v2485_v7, %v2469_v38  ;;  %v1582_v38 = vld [vmem:[#allocation2 + $0x60] sm:$0xff] }
 0x88c   :  { %v2358_v40 = vpack.c.bf16 %v1583_v39, %v1582_v38 }
 0x88d   :  { %2202 = vmatmul.mubr.msk.f32.vlgmr.msra.gmra.mrb[14].mxu0 %vm338_vm2, %v1185_v9 }
 0x88e   :  { %2337 = vmatpush3.bf16.msra.mxu0 %v2334_v17  ;;  %v2495_v17 = vld [vmem:[%s2893_s1] sm:$0xff] }
 0x88f   :  { %2339 = vmatprep.subr.bf16.mxu0 %v2338_v21 }
 0x892   :  { %2341 = vmatpush3.bf16.msra.mxu0 %v2338_v21 }
 0x893   :  { %2343 = vmatprep.subr.bf16.mxu0 %v2342_v24 }
 0x896   :  { %2345 = vmatpush3.bf16.msra.mxu0 %v2342_v24 }
 0x897   :  { %2347 = vmatprep.subr.bf16.mxu0 %v2346_v30 }
 0x89a   :  { %2349 = vmatpush3.bf16.msra.mxu0 %v2346_v30 }
 0x89b   :  { %2351 = vmatprep.subr.bf16.mxu0 %v2350_v8 }
 0x89e   :  { %2353 = vmatpush3.bf16.msra.mxu0 %v2350_v8 }
 0x89f   :  { %2355 = vmatprep.subr.bf16.mxu0 %v2354_v37 }
 0x8a2   :  { %2357 = vmatpush3.bf16.msra.mxu0 %v2354_v37 }
 0x8a3   :  { %2359 = vmatprep.subr.bf16.mxu0 %v2358_v40 }
 0x8a6   :  { %2361 = vmatpush3.bf16.msra.mxu0 %v2358_v40 }
 0x8a7   :  { %2363 = vmatprep.subr.bf16.mxu0 %v2362_v43 }
 0x8aa   :  { %2365 = vmatpush3.bf16.msra.mxu0 %v2362_v43  ;;  %v2378_v43 = vpack.c.bf16 %v1879_v41, %v1878_v3 }
 0x924   :  { %v2182_v10 = vpop.f32.mrb[8].mxu0 }
 0x925   :  { %v1258_v20 = vpop.f32.mrb[9].mxu0 }
 0x92e   :  { %v2189_v27 = vpop.f32.mrb[10].mxu0 }
 0x92f   :  { %1534 = vrot.lane.b32.xlu1 %v2189_v27, %s2528_s14  ;;  %v1347_v28 = vpop.f32.mrb[11].mxu0 }
 0x930   :  { %1532 = vrot.lane.b32.xlu0 %v1347_v28, %s2528_s14 }
 0x932   :  { %v2196_v33 = vpop.f32.mrb[12].mxu0 }
 0x933   :  { %1542 = vrot.lane.b32.xlu1 %v2196_v33, %s2529_s15  ;;  %v1434_v34 = vpop.f32.mrb[13].mxu0  ;;  %v1876_v33 = vld [vmem:[%s2903_s11] sm:$0xff] }
 0x934   :  { %1540 = vrot.lane.b32.xlu0 %v1434_v34, %s2529_s15  ;;  %v1877_v34 = vld [vmem:[%s2903_s11 + $0x8] sm:$0xff] }
 0x935   :  { %v2374_v8 = vpack.c.bf16 %v1877_v34, %v1876_v33 }
 0x960   :  { %v2203_v44 = vpop.f32.mrb[14].mxu0 }
 0x961   :  { %1550 = vrot.lane.b32.xlu1 %v2203_v44, %s2527_s30  ;;  %v1521_v45 = vpop.f32.mrb[15].mxu0  ;;  %v1998_v44 = vld [vmem:[%s2902_s10] ss:$0 sm:$0xff] }
 0x962   :  { %1548 = vrot.lane.b32.xlu0 %v1521_v45, %s2527_s30 }
 0x9a1   :  { %v1535_v46 = vpop.permute.xlu1 %1534 }
 0x9a2   :  { %v1533_v47 = vpop.permute.xlu0 %1532  ;;  %v1555_v51 = vsel %vm795_vm3, %v2182_v10, %v1535_v46 }
 0x9a3   :  { %v1554_v56 = vsel %vm795_vm3, %v1258_v20, %v1533_v47 }
 0x9a5   :  { %v1543_v48 = vpop.permute.xlu1 %1542 }
 0x9a6   :  { %v1541_v49 = vpop.permute.xlu0 %1540  ;;  %v1557_v52 = vsel %vm798_vm4, %v1555_v51, %v1543_v48 }
 0x9a7   :  { %v1556_v55 = vsel %vm798_vm4, %v1554_v56, %v1541_v49 }
 0x9d3   :  { %v1551_v53 = vpop.permute.xlu1 %1550 }
 0x9d4   :  { %v1559_v57 = vsel %vm801_vm5, %v1557_v52, %v1551_v53  ;;  %v1549_v58 = vpop.permute.xlu0 %1548 }
 0x9d5   :  { %v1567_v59 = vadd.f32 %v1994_v50, %v1559_v57  ;;  %v1558_v60 = vsel %vm801_vm5, %v1556_v55, %v1549_v58 }
 0x9d6   :  { %v1566_v4 = vadd.f32 %v1994_v50, %v1558_v60  ;;  %v2001_v50 = vld [vmem:[%s2904_s12] ss:$0 sm:$0xff] }
 0x9d7   :  { %v1569_v62 = vmax.f32 %v1567_v59, 0.0 }
 0x9d8   :  { %v1568_v61 = vmax.f32 %v1566_v4, 0.0 }
 0x9da   :  { %2236 = vmatprep.mubr.f32.mxu0 %v1568_v61 }
 0x9db   :  { %2237 = vmatmul.mubr.f32.vlgmr.msra.gmra.mrb[16].mxu0 %v1569_v62 }
 0xaae   :  { %v2238_v63 = vpop.f32.mrb[16].mxu0 }
 0xaaf   :  { %v1654_v13 = vpop.f32.mrb[17].mxu0 }
 0xab0   :  { %v2367_v0 = vpack.c.bf16 %v2238_v63, %v1654_v13 }
 0xab2   :  { %2369 = vmatpush3.bf16.xpose.msk.msra.mxu1 %vm2368_vm6, %v2367_v0 }
 0xab3   :  { %2371 = vmatprep.subr.bf16.mxu1 %v2367_v0 }
 0xab9   :  { %2244 = vmatmul.mubr.msk.f32.vlgmr.msra.gmra.mrb[8].mxu1 %vm795_vm3, %v1586_v1 }
 0xaba   :  { %2373 = vmatpush3.bf16.msra.mxu1 %v2367_v0 }
 0xabb   :  { %2375 = vmatprep.subr.bf16.mxu1 %v2374_v8 }
 0xb8c   :  { %v1738_v2 = vpop.f32.mrb[8].mxu1 }
 0xb8d   :  { %v2245_v5 = vpop.f32.mrb[9].mxu1  ;;  %v1745_v6 = vrot.slane %v1738_v2, %v1744_v12  ;;  %v1756_v18 = vrot.slane %v1738_v2, %v2649_v29 }
 0xb8f   :  { %1751 = vbcast.lane.b32.xlu1 %v1745_v6, 264  ;;  %1747 = vbcast.lane.b32.xlu0 %v1745_v6, 256 }
 0xc01   :  { %v1752_v54 = vpop.permute.xlu1 %1751  ;;  %v1748_v42 = vpop.permute.xlu0 %1747 }
 0xc02   :  { %v1758_v7 = vadd.f32 %v1756_v18, %v1752_v54  ;;  %v1757_v9 = vadd.f32 %v1756_v18, %v1748_v42 }
 0xc04   :  { %v1760_v10 = vmul.f32 0.2, %v1758_v7  ;;  %v1759_v20 = vmul.f32 0.2, %v1757_v9 }
 0xc06   :  { %v1762_v14 = vmax.f32 %v1758_v7, %v1760_v10  ;;  %v1761_v15 = vmax.f32 %v1757_v9, %v1759_v20 }
 0xc08   :  { %v1764_v11 = vadd.f32 %v2494_v16, %v1762_v14  ;;  %v1763_v19 = vadd.f32 %v2495_v17, %v1761_v15 }
 0xc0a   :  { %v1768_v29 = vsel %vm338_vm2, %v1764_v11, -inf  ;;  %v1765_v21 = vsel %vm338_vm2, %v1763_v19, -inf }
 0xc0b   :  { %1769 = vmax.xlane.f32.xlu1 %v1768_v29  ;;  %1766 = vmax.xlane.f32.xlu0 %v1765_v21 }
 0xc98   :  { %v1770_v22 = vpop.xlane.xlu1 %1769  ;;  %v1767_v23 = vpop.xlane.xlu0 %1766 }
 0xc99   :  { %v1772_v24 = vsub.f32 %v1764_v11, %v1770_v22  ;;  %v1771_v25 = vsub.f32 %v1763_v19, %v1767_v23 }
 0xc9b   :  { %v1773_v26 = vmul.f32 1.442695, %v1771_v25  ;;  %v1775_v27 = vmul.f32 1.442695, %v1772_v24 }
 0xc9d   :  { %2486 = vpow2.f32 %v1773_v26 }
 0xc9e   :  { %2488 = vpow2.f32 %v1775_v27 }
 0xca7   :  { %v2487_v28 = vpop.eup %2486 }
 0xca8   :  { %v1777_v30 = vsel %vm338_vm2, %v2487_v28, 0.0  ;;  %v2489_v31 = vpop.eup %2488 }
 0xca9   :  { %1778 = vadd.xlane.f32.xlu0 %v1777_v30  ;;  %v1780_v32 = vsel %vm338_vm2, %v2489_v31, 0.0 }
 0xcad   :  { %1781 = vadd.xlane.f32.xlu0 %v1780_v32 }
 0xd36   :  { %v1779_v35 = vpop.xlane.xlu0 %1778 }
 0xd37   :  { %2490 = vrcp.f32 %v1779_v35 }
 0xd3a   :  { %v1782_v36 = vpop.xlane.xlu0 %1781 }
 0xd3b   :  { %2492 = vrcp.f32 %v1782_v36 }
 0xd41   :  { %v2491_v37 = vpop.eup %2490 }
 0xd42   :  { %v1785_v38 = vmul.f32 %v2491_v37, %v2487_v28 }
 0xd44   :  { %2250 = vmatprep.mubr.msk.f32.mxu1 %vm338_vm2, %v1785_v38 }
 0xd45   :  { %v2493_v39 = vpop.eup %2492 }
 0xd46   :  { %v1786_v40 = vmul.f32 %v2493_v39, %v2489_v31 }
 0xd48   :  { %2251 = vmatmul.mubr.msk.f32.vlgmr.msra.gmra.mrb[10].mxu1 %vm338_vm2, %v1786_v40 }
 0xd49   :  { %2377 = vmatpush3.bf16.msra.mxu1 %v2374_v8 }
 0xd4a   :  { %2379 = vmatprep.subr.bf16.mxu1 %v2378_v43 }
 0xd4d   :  { %2381 = vmatpush3.bf16.msra.mxu1 %v2378_v43 }
 0xe1b   :  { %v2252_v45 = vpop.f32.mrb[10].mxu1 }
 0xe1c   :  { %v1871_v46 = vadd.f32 %v2252_v45, %v1998_v44  ;;  %v1865_v47 = vpop.f32.mrb[11].mxu1 }
 0xe1d   :  { %v1866_v48 = vadd.f32 %v1998_v44, %v1865_v47 }
 0xe1e   :  { %v1875_v51 = vmax.f32 %v1871_v46, 0.0 }
 0xe1f   :  { %v1874_v49 = vmax.f32 %v1866_v48, 0.0 }
 0xe21   :  { %2261 = vmatprep.mubr.msk.f32.mxu1 %vm795_vm3, %v1874_v49 }
 0xe22   :  { %2262 = vmatmul.mubr.msk.f32.vlgmr.msra.gmra.mrb[12].mxu1 %vm795_vm3, %v1875_v51 }
 0xef5   :  { %v2263_v56 = vpop.f32.mrb[12].mxu1 }
 0xef6   :  { %v1965_v52 = vadd.f32 %v2263_v56, %v2001_v50  ;;  %v1959_v53 = vpop.f32.mrb[13].mxu1 }
 0xef7   :  { %v1960_v55 = vadd.f32 %v2001_v50, %v1959_v53 }
 0xef8   :  { %1969 = vst [vmem:[%s2905_s13 + $0x8] sm:$0xff] %v1965_v52 }
 0xef9   :  { %1968 = vst [vmem:[%s2905_s13] sm:$0xff] %v1960_v55 }
 0xefa   :  { %1974 = vsyncpa [#allocation3], 1 }

</bundles_post_ra>
